<compile_context>
chip_gen: v5e
topology: v5e:2x2
jax: 0.10.0
libtpu: 0.0.40
codegen_flags: <defaults>
</compile_context>

<pallas_src>
import numpy as np
import jax
import jax.numpy as jnp
from jax.experimental import pallas as pl
from jax.experimental.pallas import tpu as pltpu

N_BATCH = 2
IMG = 28                        # 28x28x1 input implied by fc(2304) = 16*12*12
K = 5
K_PAD = 32                      # 25 conv taps zero-padded to 32
CONV_OUT = IMG - K + 1          # 24
POOL_OUT = CONV_OUT // 2        # 12
PP = POOL_OUT * POOL_OUT        # 144 pooled positions per sample
SS = 256                        # per-sample lane stride (144 padded to 2 lane tiles)
C_OUT = 16
FC_IN = C_OUT * PP              # 2304
FC_OUT = 10
O_PAD = 16                      # fc outputs padded to 16 inside each channel block
CO_BLK = C_OUT * O_PAD          # 256: stage-1 fc output width (16 channel blocks x 16)
OUT_PAD = 128                   # lane-dense logits tile


# ---------------- fused Pallas kernel ----------------

def fused_kernel(pt_ref, wc_ref, bc_ref, wd_ref, dmask_ref, bf_ref, o_ref):
    # pt_ref    (K_PAD, 4*gp)  transposed im2col patches; column = g*gp + n*SS + p,
    #                          g = 2x2 pool position, p = ph*12 + pw (zero for p>=144).
    # wc_ref    (16, K_PAD)    conv weight (tap dim zero padded)
    # bc_ref    (16, 1)        conv bias
    # wd_ref    (SS, 256)      fc weight, wd[p, c*16+o] = w_fc[o, c*144+p] (zero padded)
    # dmask_ref (16, 256)      1.0 where column block c matches the sublane channel
    # bf_ref    (1, 128)       fc bias tiled with period 16
    # o_ref     (N, 128)       logits (lane-dense; caller slices [:, :10])
    n = o_ref.shape[0]
    gp = pt_ref.shape[1] // 4            # per-group lane stride = n * SS

    # conv as one MXU matmul: channels on sublanes, (group, sample, position) on lanes
    y = jnp.dot(wc_ref[...], pt_ref[...], preferred_element_type=jnp.float32)  # (16,4gp)

    # 2x2 max-pool across the 4 group blocks (128-aligned lane slices).
    # max commutes with (+ per-channel bias, ReLU), so pool first.
    m = jnp.maximum(jnp.maximum(y[:, 0:gp], y[:, gp:2 * gp]),
                    jnp.maximum(y[:, 2 * gp:3 * gp], y[:, 3 * gp:4 * gp]))
    act = jnp.maximum(m + bc_ref[...], 0.0)                     # (16, n*SS)

    # Stack samples along sublanes; all slice offsets are 256-lane / 16-sublane aligned,
    # so this is pure vreg renaming (no masked stores, no XLU rotates).
    a2 = jnp.concatenate([act[:, i * SS:(i + 1) * SS] for i in range(n)], axis=0)

    # Stage-1 fc: contract pooled positions once. Padded positions (p >= 144) hit zero
    # rows of wd, so the relu(bias) garbage in the padded lanes never propagates.
    u = jnp.dot(a2, wd_ref[...], preferred_element_type=jnp.float32)   # (n*16, 256)

    # Keep only the block whose channel matches the sublane channel, then reduce the
    # 16 channels on the sublane axis (the reshape is a tile-aligned renaming).
    u3 = u.reshape(n, C_OUT, CO_BLK) * dmask_ref[...]           # (n, 16, 256)
    s = u3.sum(axis=1)                                          # (n, 256)

    # Fold the 16 channel blocks with a log-tree of lane rotations (exact f32 adds):
    # afterwards every lane j holds logits[n, j % 16].
    for shift in (16, 32, 64, 128):
        s = s + pltpu.roll(s, shift, 1)

    o_ref[...] = s[:, 0:OUT_PAD] + bf_ref[...]                  # lane-dense store


def _vmem():
    return pl.BlockSpec(memory_space=pltpu.MemorySpace.VMEM)


def fused_forward(patches_t, wc, bc, wd, dmask, bf, n_batch):
    return pl.pallas_call(
        fused_kernel,
        out_shape=jax.ShapeDtypeStruct((n_batch, OUT_PAD), jnp.float32),
        in_specs=[_vmem()] * 6,
        out_specs=_vmem(),
    )(patches_t, wc, bc, wd, dmask, bf)


# ---------------- parameter prep (run once, outside the forward) ----------------

def prepare_params(w_conv, b_conv, w_fc, b_fc):
    wc = jnp.pad(w_conv.reshape(C_OUT, K * K), ((0, 0), (0, K_PAD - K * K)))   # (16,32)
    bc = b_conv.reshape(C_OUT, 1)                                              # (16,1)
    # fc weight permuted to the kernel's native layout: wd[p, c*16 + o]
    wd = jnp.transpose(w_fc.reshape(FC_OUT, C_OUT, PP), (2, 1, 0))             # (144,16,10)
    wd = jnp.pad(wd, ((0, SS - PP), (0, 0), (0, O_PAD - FC_OUT)))              # (256,16,16)
    wd = wd.reshape(SS, CO_BLK)                                                # (256,256)
    # channel-block selection mask: dmask[c, j] = 1 iff j // 16 == c
    dmask = (jnp.arange(CO_BLK)[None, :] // O_PAD
             == jnp.arange(C_OUT)[:, None]).astype(jnp.float32)                # (16,256)
    # fc bias tiled with period 16 to match the folded logits layout
    bf = jnp.tile(jnp.pad(b_fc, (0, O_PAD - FC_OUT)),
                  OUT_PAD // O_PAD).reshape(1, OUT_PAD)                        # (1,128)
    return wc, bc, wd, dmask, bf


# ---------------- forward (im2col glue + fused kernel, one jitted dispatch) ----

@jax.jit
def model_forward(x, prepped):
    # x: (N, 1, 28, 28) NCHW float32, exactly the PyTorch interface.
    # TODO(synk): im2col stays as XLA glue fused under jit; a stride-2, 25-tap gather is
    # cheaper to express here than via VMEM-ref relayouts inside the kernel.
    wc, bc, wd, dmask, bf = prepped
    n = x.shape[0]
    x2 = x[:, 0]

    taps = jnp.stack(
        [x2[:, ky:ky + CONV_OUT, kx:kx + CONV_OUT] for ky in range(K) for kx in range(K)],
        axis=0)                                                   # (25, N, 24, 24)
    groups = [taps[:, :, gy::2, gx::2] for gy in range(2) for gx in range(2)]
    pt = jnp.stack(groups, axis=1).reshape(K * K, 4, n, PP)       # (25, 4, N, 144)
    pt = jnp.pad(pt, ((0, K_PAD - K * K), (0, 0), (0, 0), (0, SS - PP)))  # (32,4,N,256)
    patches_t = pt.reshape(K_PAD, 4 * n * SS)                     # (32, 4*n*256)

    logits = fused_forward(patches_t, wc, bc, wd, dmask, bf, n)   # (N, 128)
    return logits[:, :FC_OUT]


# ---------------- pure-JAX reference (PyTorch semantics) ----------------

def ref_forward(x, params):
    w_conv, b_conv, w_fc, b_fc = params
    n = x.shape[0]
    x2 = x[:, 0, :, :]
    patches = jnp.stack(
        [x2[:, dy:dy + CONV_OUT, dx:dx + CONV_OUT] for dy in range(K) for dx in range(K)],
        axis=-1,
    )  # (N, 24, 24, 25)
    conv = jnp.einsum("nhwp,cp->nchw", patches, w_conv.reshape(C_OUT, K * K))
    conv = conv + b_conv[None, :, None, None]
    conv = jnp.maximum(conv, 0.0)
    pooled = conv.reshape(n, C_OUT, POOL_OUT, 2, POOL_OUT, 2).max(axis=(3, 5))
    feat = pooled.reshape(n, FC_IN)                               # c*144 + h*12 + w order
    return feat @ w_fc.T + b_fc[None, :]


if __name__ == "__main__":
    key = jax.random.PRNGKey(0)
    k1, k2, k3, k4, k5 = jax.random.split(key, 5)
    x = jax.random.normal(k1, (N_BATCH, 1, IMG, IMG), jnp.float32)
    w_conv = jax.random.normal(k2, (C_OUT, 1, K, K), jnp.float32) * 0.2
    b_conv = jax.random.normal(k3, (C_OUT,), jnp.float32) * 0.1
    w_fc = jax.random.normal(k4, (FC_OUT, FC_IN), jnp.float32) * 0.02
    b_fc = jax.random.normal(k5, (FC_OUT,), jnp.float32) * 0.1

    prepped = prepare_params(w_conv, b_conv, w_fc, b_fc)   # hoisted: done once

    out = model_forward(x, prepped)
    jax.block_until_ready(out)
    assert out.shape == (N_BATCH, FC_OUT)

    ref = ref_forward(x, (w_conv, b_conv, w_fc, b_fc))
    np.testing.assert_allclose(np.asarray(out), np.asarray(ref), rtol=1e-3, atol=1e-3)
    print("KERNEL_OK")
</pallas_src>

<mosaic_0001>
module attributes {stable_mosaic.version = 11 : i64} {
  func.func @fused_kernel(%arg0: memref<32x2048xf32, #tpu.memory_space<vmem>>, %arg1: memref<16x32xf32, #tpu.memory_space<vmem>>, %arg2: memref<16x1xf32, #tpu.memory_space<vmem>>, %arg3: memref<256x256xf32, #tpu.memory_space<vmem>>, %arg4: memref<16x256xf32, #tpu.memory_space<vmem>>, %arg5: memref<1x128xf32, #tpu.memory_space<vmem>>, %arg6: memref<2x128xf32, #tpu.memory_space<vmem>>) attributes {dimension_semantics = [], scalar_prefetch = 0 : i64, scratch_operands = 0 : i64, tpu.core_type = #tpu.core_type<tc>} {
    %c0 = arith.constant 0 : index
    %c0_0 = arith.constant 0 : index
    %0 = vector.load %arg1[%c0, %c0_0] : memref<16x32xf32, #tpu.memory_space<vmem>>, vector<16x32xf32>
    %c0_1 = arith.constant 0 : index
    %c0_2 = arith.constant 0 : index
    %1 = vector.load %arg0[%c0_1, %c0_2] : memref<32x2048xf32, #tpu.memory_space<vmem>>, vector<32x2048xf32>
    %cst = arith.constant dense<0.000000e+00> : vector<16x2048xf32>
    %2 = tpu.matmul %0, %1, %cst {dimension_numbers = #tpu.dot_dimension_numbers<[1], [0], [0], [1], [0, 0, 1, 1], [], []>} : vector<16x32xf32>, vector<32x2048xf32>, vector<16x2048xf32> -> vector<16x2048xf32>
    %3 = vector.extract_strided_slice %2 {offsets = [0, 0], sizes = [16, 512], strides = [1, 1]} : vector<16x2048xf32> to vector<16x512xf32>
    %4 = vector.extract_strided_slice %2 {offsets = [0, 512], sizes = [16, 512], strides = [1, 1]} : vector<16x2048xf32> to vector<16x512xf32>
    %5 = arith.maximumf %3, %4 : vector<16x512xf32>
    %6 = vector.extract_strided_slice %2 {offsets = [0, 1024], sizes = [16, 512], strides = [1, 1]} : vector<16x2048xf32> to vector<16x512xf32>
    %7 = vector.extract_strided_slice %2 {offsets = [0, 1536], sizes = [16, 512], strides = [1, 1]} : vector<16x2048xf32> to vector<16x512xf32>
    %8 = arith.maximumf %6, %7 : vector<16x512xf32>
    %9 = arith.maximumf %5, %8 : vector<16x512xf32>
    %c0_3 = arith.constant 0 : index
    %c0_4 = arith.constant 0 : index
    %10 = vector.load %arg2[%c0_3, %c0_4] : memref<16x1xf32, #tpu.memory_space<vmem>>, vector<16x1xf32>
    %11 = vector.broadcast %10 : vector<16x1xf32> to vector<16x512xf32>
    %12 = arith.addf %9, %11 : vector<16x512xf32>
    %cst_5 = arith.constant 0.000000e+00 : f32
    %13 = vector.broadcast %cst_5 : f32 to vector<16x512xf32>
    %14 = arith.maximumf %12, %13 : vector<16x512xf32>
    %15 = vector.extract_strided_slice %14 {offsets = [0, 0], sizes = [16, 256], strides = [1, 1]} : vector<16x512xf32> to vector<16x256xf32>
    %16 = vector.extract_strided_slice %14 {offsets = [0, 256], sizes = [16, 256], strides = [1, 1]} : vector<16x512xf32> to vector<16x256xf32>
    %17 = tpu.concatenate %15, %16 in 0 : vector<16x256xf32>, vector<16x256xf32> -> vector<32x256xf32>
    %c0_6 = arith.constant 0 : index
    %c0_7 = arith.constant 0 : index
    %18 = vector.load %arg3[%c0_6, %c0_7] : memref<256x256xf32, #tpu.memory_space<vmem>>, vector<256x256xf32>
    %cst_8 = arith.constant dense<0.000000e+00> : vector<32x256xf32>
    %19 = tpu.matmul %17, %18, %cst_8 {dimension_numbers = #tpu.dot_dimension_numbers<[1], [0], [0], [1], [0, 0, 1, 1], [], []>} : vector<32x256xf32>, vector<256x256xf32>, vector<32x256xf32> -> vector<32x256xf32>
    %20 = vector.shape_cast %19 : vector<32x256xf32> to vector<2x16x256xf32>
    %c0_9 = arith.constant 0 : index
    %c0_10 = arith.constant 0 : index
    %21 = vector.load %arg4[%c0_9, %c0_10] : memref<16x256xf32, #tpu.memory_space<vmem>>, vector<16x256xf32>
    %22 = vector.shape_cast %21 : vector<16x256xf32> to vector<1x16x256xf32>
    %23 = vector.broadcast %22 : vector<1x16x256xf32> to vector<2x16x256xf32>
    %24 = arith.mulf %20, %23 : vector<2x16x256xf32>
    %cst_11 = arith.constant dense<0.000000e+00> : vector<2x256xf32>
    %25 = vector.multi_reduction <add>, %24, %cst_11 [1] : vector<2x16x256xf32> to vector<2x256xf32>
    %c16_i32 = arith.constant 16 : i32
    %26 = tpu.dynamic_rotate %25 by %c16_i32 dim 1 : vector<2x256xf32>, i32 -> vector<2x256xf32>
    %27 = arith.addf %25, %26 : vector<2x256xf32>
    %c32_i32 = arith.constant 32 : i32
    %28 = tpu.dynamic_rotate %27 by %c32_i32 dim 1 : vector<2x256xf32>, i32 -> vector<2x256xf32>
    %29 = arith.addf %27, %28 : vector<2x256xf32>
    %c64_i32 = arith.constant 64 : i32
    %30 = tpu.dynamic_rotate %29 by %c64_i32 dim 1 : vector<2x256xf32>, i32 -> vector<2x256xf32>
    %31 = arith.addf %29, %30 : vector<2x256xf32>
    %c128_i32 = arith.constant 128 : i32
    %32 = tpu.dynamic_rotate %31 by %c128_i32 dim 1 : vector<2x256xf32>, i32 -> vector<2x256xf32>
    %33 = arith.addf %31, %32 : vector<2x256xf32>
    %34 = vector.extract_strided_slice %33 {offsets = [0, 0], sizes = [2, 128], strides = [1, 1]} : vector<2x256xf32> to vector<2x128xf32>
    %c0_12 = arith.constant 0 : index
    %c0_13 = arith.constant 0 : index
    %35 = vector.load %arg5[%c0_12, %c0_13] : memref<1x128xf32, #tpu.memory_space<vmem>>, vector<1x128xf32>
    %36 = vector.broadcast %35 : vector<1x128xf32> to vector<2x128xf32>
    %37 = arith.addf %34, %36 : vector<2x128xf32>
    %c0_14 = arith.constant 0 : index
    %c0_15 = arith.constant 0 : index
    %38 = vector.load %arg6[%c0_14, %c0_15] : memref<2x128xf32, #tpu.memory_space<vmem>>, vector<2x128xf32>
    tpu.vector_store %arg6[%c0_14, %c0_15], %37 {strides = array<i32>} : memref<2x128xf32, #tpu.memory_space<vmem>>, vector<2x128xf32>,
    return
  }
}

</mosaic_0001>

<bundles_post_ra>
// kernel: model_forward.1
= control target key start
LH: loop header
LB: loop body
LE: loop exit
PB: predicated region body
PF: predicated region fallthrough
CT: control target
= control target key end

     0   :  { %vm90_vm0 = vcmask 261120   ;;  %s1487_s0 = inlined_call_operand.vmem [shape: f32[32,2048], index: 0, kind: input, shape index: {}]   ;;  %s1488_s1 = inlined_call_operand.vmem [shape: f32[16,32], index: 1, kind: input, shape index: {}]   ;;  %s1489_s2 = inlined_call_operand.vmem [shape: f32[16,1], index: 2, kind: input, shape index: {}]   ;;  %s1490_s3 = inlined_call_operand.vmem [shape: f32[256,256], index: 3, kind: input, shape index: {}]   ;;  %s1491_s4 = inlined_call_operand.vmem [shape: f32[16,256], index: 4, kind: input, shape index: {}]   ;;  %s1492_s5 = inlined_call_operand.vmem [shape: f32[1,128], index: 5, kind: input, shape index: {}]   ;;  %s1493_s6 = inlined_call_operand.hbm [shape: f32[2,128], index: 6, kind: output, shape index: {}]  }
   0x1   :  { %v74_v0 = vld [vmem:[%s1487_s0 + $0x180] sm:$0xff]  ;;  %v75_v1 = vld [vmem:[%s1487_s0 + $0x188] sm:$0xff]  ;;  %v76_v2 = vld [vmem:[%s1487_s0 + $0x190] sm:$0xff] }
   0x2   :  { %109 = vmatpush.msra.mxu0 %v74_v0  ;;  %132 = vmatpush.msra.mxu1 %v75_v1  ;;  %v77_v3 = vld [vmem:[%s1487_s0 + $0x198] sm:$0xff]  ;;  %v58_v4 = vld [vmem:[%s1487_s0 + $0x100] sm:$0xff]  ;;  %v59_v5 = vld [vmem:[%s1487_s0 + $0x108] sm:$0xff] }
   0x3   :  { %155 = vmatpush.msra.mxu2 %v76_v2  ;;  %178 = vmatpush.msra.mxu3 %v77_v3  ;;  %v60_v6 = vld [vmem:[%s1487_s0 + $0x110] sm:$0xff]  ;;  %v61_v7 = vld [vmem:[%s1487_s0 + $0x118] sm:$0xff]  ;;  %v42_v8 = vld [vmem:[%s1487_s0 + $0x80] sm:$0xff] }
   0x4   :  { %110 = vmatpush.msra.mxu0 %v58_v4  ;;  %133 = vmatpush.msra.mxu1 %v59_v5  ;;  %v43_v9 = vld [vmem:[%s1487_s0 + $0x88] sm:$0xff]  ;;  %v44_v10 = vld [vmem:[%s1487_s0 + $0x90] sm:$0xff]  ;;  %v45_v11 = vld [vmem:[%s1487_s0 + $0x98] sm:$0xff] }
   0x5   :  { %156 = vmatpush.msra.mxu2 %v60_v6  ;;  %179 = vmatpush.msra.mxu3 %v61_v7  ;;  %v26_v12 = vld [vmem:[%s1487_s0] sm:$0xff]  ;;  %v27_v13 = vld [vmem:[%s1487_s0 + $0x8] sm:$0xff]  ;;  %v28_v14 = vld [vmem:[%s1487_s0 + $0x10] sm:$0xff] }
   0x6   :  { %111 = vmatpush.msra.mxu0 %v42_v8  ;;  %134 = vmatpush.msra.mxu1 %v43_v9  ;;  %v29_v15 = vld [vmem:[%s1487_s0 + $0x18] sm:$0xff]  ;;  %v1018_v16 = vld [vmem:[%s1488_s1] sm:$0xff]  ;;  %v79_v18 = vld [vmem:[%s1487_s0 + $0x1a8] sm:$0xff] }
   0x7   :  { %157 = vmatpush.msra.mxu2 %v44_v10  ;;  %180 = vmatpush.msra.mxu3 %v45_v11  ;;  %v78_v17 = vld [vmem:[%s1487_s0 + $0x1a0] sm:$0xff]  ;;  %v80_v19 = vld [vmem:[%s1487_s0 + $0x1b0] sm:$0xff]  ;;  %v81_v20 = vld [vmem:[%s1487_s0 + $0x1b8] sm:$0xff] }
   0x8   :  { %112 = vmatpush.msra.mxu0 %v26_v12  ;;  %135 = vmatpush.msra.mxu1 %v27_v13  ;;  %v62_v21 = vld [vmem:[%s1487_s0 + $0x120] sm:$0xff]  ;;  %v63_v22 = vld [vmem:[%s1487_s0 + $0x128] sm:$0xff]  ;;  %v64_v23 = vld [vmem:[%s1487_s0 + $0x130] sm:$0xff] }
   0x9   :  { %158 = vmatpush.msra.mxu2 %v28_v14  ;;  %181 = vmatpush.msra.mxu3 %v29_v15  ;;  %v65_v24 = vld [vmem:[%s1487_s0 + $0x138] sm:$0xff]  ;;  %v46_v25 = vld [vmem:[%s1487_s0 + $0xa0] sm:$0xff]  ;;  %v47_v26 = vld [vmem:[%s1487_s0 + $0xa8] sm:$0xff] }
   0xa   :  { %862 = vmatmul.msk.f32.vlgmr.msra.gmra.mxu0 %vm90_vm0, %v1018_v16  ;;  %864 = vmatmul.msk.f32.vlgmr.msra.gmra.mxu1 %vm90_vm0, %v1018_v16  ;;  %v48_v27 = vld [vmem:[%s1487_s0 + $0xb0] sm:$0xff]  ;;  %v49_v28 = vld [vmem:[%s1487_s0 + $0xb8] sm:$0xff]  ;;  %v1067_v29 = vld [vmem:[%s1488_s1 + $0x8] sm:$0xff] }
   0xb   :  { %866 = vmatmul.msk.f32.vlgmr.msra.gmra.mxu2 %vm90_vm0, %v1018_v16  ;;  %868 = vmatmul.msk.f32.vlgmr.msra.gmra.mxu3 %vm90_vm0, %v1018_v16  ;;  %v30_v30 = vld [vmem:[%s1487_s0 + $0x20] sm:$0xff]  ;;  %v31_v31 = vld [vmem:[%s1487_s0 + $0x28] sm:$0xff]  ;;  %v32_v32 = vld [vmem:[%s1487_s0 + $0x30] sm:$0xff] }
   0xc   :  { %201 = vmatpush.msrb.mxu0 %v78_v17  ;;  %224 = vmatpush.msrb.mxu1 %v79_v18  ;;  %v33_v33 = vld [vmem:[%s1487_s0 + $0x38] sm:$0xff]  ;;  %v82_v34 = vld [vmem:[%s1487_s0 + $0x1c0] sm:$0xff]  ;;  %v83_v35 = vld [vmem:[%s1487_s0 + $0x1c8] sm:$0xff] }
   0xd   :  { %247 = vmatpush.msrb.mxu2 %v80_v19  ;;  %270 = vmatpush.msrb.mxu3 %v81_v20  ;;  %v84_v36 = vld [vmem:[%s1487_s0 + $0x1d0] sm:$0xff]  ;;  %v85_v37 = vld [vmem:[%s1487_s0 + $0x1d8] sm:$0xff]  ;;  %v66_v38 = vld [vmem:[%s1487_s0 + $0x140] sm:$0xff] }
   0xe   :  { %202 = vmatpush.msrb.mxu0 %v62_v21  ;;  %225 = vmatpush.msrb.mxu1 %v63_v22  ;;  %v67_v39 = vld [vmem:[%s1487_s0 + $0x148] sm:$0xff]  ;;  %v68_v40 = vld [vmem:[%s1487_s0 + $0x150] sm:$0xff]  ;;  %v69_v41 = vld [vmem:[%s1487_s0 + $0x158] sm:$0xff] }
   0xf   :  { %248 = vmatpush.msrb.mxu2 %v64_v23  ;;  %271 = vmatpush.msrb.mxu3 %v65_v24 }
  0x10   :  { %203 = vmatpush.msrb.mxu0 %v46_v25  ;;  %226 = vmatpush.msrb.mxu1 %v47_v26 }
  0x11   :  { %249 = vmatpush.msrb.mxu2 %v48_v27  ;;  %272 = vmatpush.msrb.mxu3 %v49_v28 }
  0x12   :  { %863 = vmatmul.msk.f32.gmra.mxu0 %vm90_vm0, %v1067_v29  ;;  %865 = vmatmul.msk.f32.gmra.mxu1 %vm90_vm0, %v1067_v29 }
  0x13   :  { %867 = vmatmul.msk.f32.gmra.mxu2 %vm90_vm0, %v1067_v29  ;;  %869 = vmatmul.msk.f32.gmra.mxu3 %vm90_vm0, %v1067_v29 }
  0x14   :  { %204 = vmatpush.msrb.mxu0 %v30_v30  ;;  %227 = vmatpush.msrb.mxu1 %v31_v31 }
  0x15   :  { %250 = vmatpush.msrb.mxu2 %v32_v32  ;;  %273 = vmatpush.msrb.mxu3 %v33_v33 }
  0x16   :  { %293 = vmatpush.msra.mxu0 %v82_v34  ;;  %316 = vmatpush.msra.mxu1 %v83_v35 }
  0x17   :  { %339 = vmatpush.msra.mxu2 %v84_v36  ;;  %362 = vmatpush.msra.mxu3 %v85_v37 }
  0x18   :  { %11 = vsyncpa [#allocation3], 0  ;;  %294 = vmatpush.msra.mxu0 %v66_v38  ;;  %317 = vmatpush.msra.mxu1 %v67_v39  ;;  %v50_v42 = vld [vmem:[%s1487_s0 + $0xc0] sm:$0xff]  ;;  %v51_v43 = vld [vmem:[%s1487_s0 + $0xc8] sm:$0xff]  ;;  %v927_v3 = vmov 0   ;;  %vm741_vm1 = vcmask 1041409  }
  0x19   :  { %340 = vmatpush.msra.mxu2 %v68_v40  ;;  %363 = vmatpush.msra.mxu3 %v69_v41  ;;  %v52_v44 = vld [vmem:[%s1487_s0 + $0xd0] sm:$0xff]  ;;  %v53_v45 = vld [vmem:[%s1487_s0 + $0xd8] sm:$0xff]  ;;  %v34_v46 = vld [vmem:[%s1487_s0 + $0x40] sm:$0xff]  ;;  %s930_s9 = smov 64   ;;  %s931_s12 = smov [#allocation2]  }
  0x1a   :  { %870 = vmatmul.msk.f32.vlgmr.msrb.gmra.mxu0 %vm90_vm0, %v1018_v16  ;;  %872 = vmatmul.msk.f32.vlgmr.msrb.gmra.mxu1 %vm90_vm0, %v1018_v16  ;;  %v35_v47 = vld [vmem:[%s1487_s0 + $0x48] sm:$0xff]  ;;  %v36_v48 = vld [vmem:[%s1487_s0 + $0x50] sm:$0xff]  ;;  %v37_v49 = vld [vmem:[%s1487_s0 + $0x58] sm:$0xff]  ;;  %s851_s1 = sshll.u32 %s931_s12, 4  ;;  %s853_s15 = sshll.u32 %s1493_s6, 4  ;;  %s852_s1 = int_to_ptr.vmem [resolvable:$true] %s851_s1  ;;  %s854_s15 = int_to_ptr.hbm [resolvable:$true] %s853_s15 }
  0x1b   :  { %874 = vmatmul.msk.f32.vlgmr.msrb.gmra.mxu2 %vm90_vm0, %v1018_v16  ;;  %876 = vmatmul.msk.f32.vlgmr.msrb.gmra.mxu3 %vm90_vm0, %v1018_v16  ;;  %v86_v50 = vld [vmem:[%s1487_s0 + $0x1e0] sm:$0xff]  ;;  %v87_v51 = vld [vmem:[%s1487_s0 + $0x1e8] sm:$0xff]  ;;  %v88_v52 = vld [vmem:[%s1487_s0 + $0x1f0] sm:$0xff] }
  0x1c   :  { %295 = vmatpush.msra.mxu0 %v50_v42  ;;  %318 = vmatpush.msra.mxu1 %v51_v43  ;;  %v89_v53 = vld [vmem:[%s1487_s0 + $0x1f8] sm:$0xff]  ;;  %v70_v54 = vld [vmem:[%s1487_s0 + $0x160] sm:$0xff]  ;;  %v71_v55 = vld [vmem:[%s1487_s0 + $0x168] sm:$0xff] }
  0x1d   :  { %341 = vmatpush.msra.mxu2 %v52_v44  ;;  %364 = vmatpush.msra.mxu3 %v53_v45  ;;  %v72_v56 = vld [vmem:[%s1487_s0 + $0x170] sm:$0xff]  ;;  %v73_v57 = vld [vmem:[%s1487_s0 + $0x178] sm:$0xff]  ;;  %v54_v58 = vld [vmem:[%s1487_s0 + $0xe0] sm:$0xff] }
  0x1e   :  { %296 = vmatpush.msra.mxu0 %v34_v46  ;;  %319 = vmatpush.msra.mxu1 %v35_v47  ;;  %v55_v59 = vld [vmem:[%s1487_s0 + $0xe8] sm:$0xff]  ;;  %v56_v60 = vld [vmem:[%s1487_s0 + $0xf0] sm:$0xff]  ;;  %v57_v61 = vld [vmem:[%s1487_s0 + $0xf8] sm:$0xff] }
  0x1f   :  { %342 = vmatpush.msra.mxu2 %v36_v48  ;;  %365 = vmatpush.msra.mxu3 %v37_v49  ;;  %v38_v62 = vld [vmem:[%s1487_s0 + $0x60] sm:$0xff]  ;;  %v39_v63 = vld [vmem:[%s1487_s0 + $0x68] sm:$0xff]  ;;  %v40_v0 = vld [vmem:[%s1487_s0 + $0x70] sm:$0xff] }
  0x20   :  { %385 = vmatpush.msrb.mxu0 %v86_v50  ;;  %408 = vmatpush.msrb.mxu1 %v87_v51  ;;  %v41_v1 = vld [vmem:[%s1487_s0 + $0x78] sm:$0xff]  ;;  %v489_v2 = vld [vmem:[%s1489_s2] sm:$0xff]  ;;  %v490_v4 = vld [vmem:[%s1489_s2 + $0x8] sm:$0xff]  ;;  %s929_s2 = smov 32  }
  0x21   :  { %431 = vmatpush.msrb.mxu2 %v88_v52  ;;  %454 = vmatpush.msrb.mxu3 %v89_v53  ;;  %v547_v5 = vld [vmem:[%s1490_s3 + $0xf0] sm:$0xff]  ;;  %v548_v7 = vld [vmem:[%s1490_s3 + $0xf8] sm:$0xff]  ;;  %v545_v9 = vld [vmem:[%s1490_s3 + $0xe0] sm:$0xff] }
  0x22   :  { %871 = vmatmul.msk.f32.gmra.mxu0 %vm90_vm0, %v1067_v29  ;;  %873 = vmatmul.msk.f32.gmra.mxu1 %vm90_vm0, %v1067_v29  ;;  %v579_v6 = vld [vmem:[%s1490_s3 + $0x1f0] sm:$0xff]  ;;  %v580_v8 = vld [vmem:[%s1490_s3 + $0x1f8] sm:$0xff]  ;;  %v577_v10 = vld [vmem:[%s1490_s3 + $0x1e0] sm:$0xff] }
  0x23   :  { %875 = vmatmul.msk.f32.gmra.mxu2 %vm90_vm0, %v1067_v29  ;;  %877 = vmatmul.msk.f32.gmra.mxu3 %vm90_vm0, %v1067_v29  ;;  %v546_v11 = vld [vmem:[%s1490_s3 + $0xe8] sm:$0xff]  ;;  %v543_v13 = vld [vmem:[%s1490_s3 + $0xd0] sm:$0xff]  ;;  %v544_v15 = vld [vmem:[%s1490_s3 + $0xd8] sm:$0xff] }
  0x24   :  { %386 = vmatpush.msrb.mxu0 %v70_v54  ;;  %409 = vmatpush.msrb.mxu1 %v71_v55  ;;  %v578_v12 = vld [vmem:[%s1490_s3 + $0x1e8] sm:$0xff]  ;;  %v575_v14 = vld [vmem:[%s1490_s3 + $0x1d0] sm:$0xff]  ;;  %v541_v19 = vld [vmem:[%s1490_s3 + $0xc0] sm:$0xff] }
  0x25   :  { %432 = vmatpush.msrb.mxu2 %v72_v56  ;;  %455 = vmatpush.msrb.mxu3 %v73_v57  ;;  %v573_v20 = vld [vmem:[%s1490_s3 + $0x1c0] sm:$0xff]  ;;  %v542_v21 = vld [vmem:[%s1490_s3 + $0xc8] sm:$0xff]  ;;  %v539_v23 = vld [vmem:[%s1490_s3 + $0xb0] sm:$0xff] }
  0x26   :  { %387 = vmatpush.msrb.mxu0 %v54_v58  ;;  %410 = vmatpush.msrb.mxu1 %v55_v59  ;;  %v574_v22 = vld [vmem:[%s1490_s3 + $0x1c8] sm:$0xff]  ;;  %v571_v24 = vld [vmem:[%s1490_s3 + $0x1b0] sm:$0xff]  ;;  %v540_v25 = vld [vmem:[%s1490_s3 + $0xb8] sm:$0xff] }
  0x27   :  { %433 = vmatpush.msrb.mxu2 %v56_v60  ;;  %456 = vmatpush.msrb.mxu3 %v57_v61  ;;  %v572_v26 = vld [vmem:[%s1490_s3 + $0x1b8] sm:$0xff]  ;;  %v537_v27 = vld [vmem:[%s1490_s3 + $0xa0] sm:$0xff]  ;;  %v570_v30 = vld [vmem:[%s1490_s3 + $0x1a8] sm:$0xff] }
  0x28   :  { %388 = vmatpush.msrb.mxu0 %v38_v62  ;;  %411 = vmatpush.msrb.mxu1 %v39_v63  ;;  %v569_v28 = vld [vmem:[%s1490_s3 + $0x1a0] sm:$0xff]  ;;  %v535_v31 = vld [vmem:[%s1490_s3 + $0x90] sm:$0xff]  ;;  %v536_v33 = vld [vmem:[%s1490_s3 + $0x98] sm:$0xff] }
  0x29   :  { %434 = vmatpush.msrb.mxu2 %v40_v0  ;;  %457 = vmatpush.msrb.mxu3 %v41_v1  ;;  %v567_v32 = vld [vmem:[%s1490_s3 + $0x190] sm:$0xff]  ;;  %v568_v36 = vld [vmem:[%s1490_s3 + $0x198] sm:$0xff]  ;;  %v533_v39 = vld [vmem:[%s1490_s3 + $0x80] sm:$0xff] }
  0x2a   :  { %878 = vmatmul.msk.f32.vlgmr.msra.gmra.mxu0 %vm90_vm0, %v1018_v16  ;;  %880 = vmatmul.msk.f32.vlgmr.msra.gmra.mxu1 %vm90_vm0, %v1018_v16  ;;  %v565_v40 = vld [vmem:[%s1490_s3 + $0x180] sm:$0xff]  ;;  %v534_v41 = vld [vmem:[%s1490_s3 + $0x88] sm:$0xff]  ;;  %v531_v43 = vld [vmem:[%s1490_s3 + $0x70] sm:$0xff] }
  0x2b   :  { %882 = vmatmul.msk.f32.vlgmr.msra.gmra.mxu2 %vm90_vm0, %v1018_v16  ;;  %884 = vmatmul.msk.f32.vlgmr.msra.gmra.mxu3 %vm90_vm0, %v1018_v16  ;;  %v566_v42 = vld [vmem:[%s1490_s3 + $0x188] sm:$0xff]  ;;  %v563_v44 = vld [vmem:[%s1490_s3 + $0x170] sm:$0xff]  ;;  %v532_v45 = vld [vmem:[%s1490_s3 + $0x78] sm:$0xff] }
  0x2c   :  { %899 = vset.pattern.permute.xlu0 %v927_v3  ;;  %581 = vmatpush.msra.mxu0 %v547_v5  ;;  %v564_v46 = vld [vmem:[%s1490_s3 + $0x178] sm:$0xff]  ;;  %v529_v47 = vld [vmem:[%s1490_s3 + $0x60] sm:$0xff]  ;;  %v530_v49 = vld [vmem:[%s1490_s3 + $0x68] sm:$0xff] }
  0x2d   :  { %493 = vperm.xlu0 %899, %v489_v2   ;;  %610 = vmatpush.msra.mxu1 %v579_v6  ;;  %v561_v48 = vld [vmem:[%s1490_s3 + $0x160] sm:$0xff]  ;;  %v562_v50 = vld [vmem:[%s1490_s3 + $0x168] sm:$0xff]  ;;  %v527_v51 = vld [vmem:[%s1490_s3 + $0x50] sm:$0xff] }
  0x2e   :  { %639 = vmatpush.msra.mxu2 %v548_v7  ;;  %668 = vmatpush.msra.mxu3 %v580_v8  ;;  %v559_v52 = vld [vmem:[%s1490_s3 + $0x150] sm:$0xff]  ;;  %v528_v53 = vld [vmem:[%s1490_s3 + $0x58] sm:$0xff]  ;;  %v525_v59 = vld [vmem:[%s1490_s3 + $0x40] sm:$0xff] }
  0x2f   :  { %582 = vmatpush.msra.mxu0 %v545_v9  ;;  %611 = vmatpush.msra.mxu1 %v577_v10  ;;  %v560_v56 = vld [vmem:[%s1490_s3 + $0x158] sm:$0xff]  ;;  %v557_v60 = vld [vmem:[%s1490_s3 + $0x140] sm:$0xff]  ;;  %v526_v61 = vld [vmem:[%s1490_s3 + $0x48] sm:$0xff] }
  0x30   :  { %640 = vmatpush.msra.mxu2 %v546_v11  ;;  %669 = vmatpush.msra.mxu3 %v578_v12  ;;  %v558_v62 = vld [vmem:[%s1490_s3 + $0x148] sm:$0xff]  ;;  %v523_v63 = vld [vmem:[%s1490_s3 + $0x30] sm:$0xff]  ;;  %v524_v1 = vld [vmem:[%s1490_s3 + $0x38] sm:$0xff] }
  0x31   :  { %583 = vmatpush.msra.mxu0 %v543_v13  ;;  %612 = vmatpush.msra.mxu1 %v575_v14  ;;  %v555_v0 = vld [vmem:[%s1490_s3 + $0x130] sm:$0xff]  ;;  %v556_v2 = vld [vmem:[%s1490_s3 + $0x138] sm:$0xff]  ;;  %v521_v3 = vld [vmem:[%s1490_s3 + $0x20] sm:$0xff] }
  0x32   :  { %879 = vmatmul.msk.f32.gmra.mxu0 %vm90_vm0, %v1067_v29  ;;  %881 = vmatmul.msk.f32.gmra.mxu1 %vm90_vm0, %v1067_v29  ;;  %v522_v5 = vld [vmem:[%s1490_s3 + $0x28] sm:$0xff]  ;;  %v519_v7 = vld [vmem:[%s1490_s3 + $0x10] sm:$0xff]  ;;  %v520_v9 = vld [vmem:[%s1490_s3 + $0x18] sm:$0xff] }
  0x33   :  { %883 = vmatmul.msk.f32.gmra.mxu2 %vm90_vm0, %v1067_v29  ;;  %885 = vmatmul.msk.f32.gmra.mxu3 %vm90_vm0, %v1067_v29  ;;  %v554_v6 = vld [vmem:[%s1490_s3 + $0x128] sm:$0xff]  ;;  %v551_v8 = vld [vmem:[%s1490_s3 + $0x110] sm:$0xff]  ;;  %v552_v12 = vld [vmem:[%s1490_s3 + $0x118] sm:$0xff] }
  0x34   :  { %641 = vmatpush.msra.mxu2 %v544_v15  ;;  %584 = vmatpush.msra.mxu0 %v541_v19  ;;  %v517_v15 = vld [vmem:[%s1490_s3] sm:$0xff]  ;;  %v518_v19 = vld [vmem:[%s1490_s3 + $0x8] sm:$0xff] }
  0x35   :  { %498 = vperm.xlu0 %899, %v490_v4   ;;  %613 = vmatpush.msra.mxu1 %v573_v20  ;;  %v553_v4 = vld [vmem:[%s1490_s3 + $0x120] sm:$0xff]  ;;  %v550_v20 = vld [vmem:[%s1490_s3 + $0x108] sm:$0xff] }
  0x36   :  { %642 = vmatpush.msra.mxu2 %v542_v21  ;;  %585 = vmatpush.msra.mxu0 %v539_v23 }
  0x37   :  { %614 = vmatpush.msra.mxu1 %v571_v24 }
  0x38   :  { %643 = vmatpush.msra.mxu2 %v540_v25  ;;  %586 = vmatpush.msra.mxu0 %v537_v27 }
  0x39   :  { %615 = vmatpush.msra.mxu1 %v569_v28 }
  0x3a   :  { %886 = vmatmul.msk.f32.vlgmr.msrb.gmra.mxu0 %vm90_vm0, %v1018_v16  ;;  %888 = vmatmul.msk.f32.vlgmr.msrb.gmra.mxu1 %vm90_vm0, %v1018_v16 }
  0x3b   :  { %890 = vmatmul.msk.f32.vlgmr.msrb.gmra.mxu2 %vm90_vm0, %v1018_v16  ;;  %892 = vmatmul.msk.f32.vlgmr.msrb.gmra.mxu3 %vm90_vm0, %v1018_v16  ;;  %v576_v16 = vld [vmem:[%s1490_s3 + $0x1d8] sm:$0xff] }
  0x3c   :  { %670 = vmatpush.msra.mxu3 %v576_v16  ;;  %587 = vmatpush.msra.mxu0 %v535_v31  ;;  %v549_v16 = vld [vmem:[%s1490_s3 + $0x100] sm:$0xff] }
  0x3d   :  { %616 = vmatpush.msra.mxu1 %v567_v32 }
  0x3e   :  { %671 = vmatpush.msra.mxu3 %v574_v22  ;;  %588 = vmatpush.msra.mxu0 %v533_v39 }
  0x3f   :  { %617 = vmatpush.msra.mxu1 %v565_v40 }
  0x40   :  { %672 = vmatpush.msra.mxu3 %v572_v26  ;;  %589 = vmatpush.msra.mxu0 %v531_v43 }
  0x41   :  { %618 = vmatpush.msra.mxu1 %v563_v44 }
  0x42   :  { %887 = vmatmul.msk.f32.gmra.mxu0 %vm90_vm0, %v1067_v29  ;;  %889 = vmatmul.msk.f32.gmra.mxu1 %vm90_vm0, %v1067_v29 }
  0x43   :  { %891 = vmatmul.msk.f32.gmra.mxu2 %vm90_vm0, %v1067_v29  ;;  %893 = vmatmul.msk.f32.gmra.mxu3 %vm90_vm0, %v1067_v29  ;;  %v538_v29 = vld [vmem:[%s1490_s3 + $0xa8] sm:$0xff] }
  0x44   :  { %644 = vmatpush.msra.mxu2 %v538_v29  ;;  %673 = vmatpush.msra.mxu3 %v570_v30 }
  0x45   :  { %590 = vmatpush.msra.mxu0 %v529_v47  ;;  %619 = vmatpush.msra.mxu1 %v561_v48 }
  0x46   :  { %645 = vmatpush.msra.mxu2 %v536_v33  ;;  %674 = vmatpush.msra.mxu3 %v568_v36 }
  0x47   :  { %591 = vmatpush.msra.mxu0 %v527_v51  ;;  %620 = vmatpush.msra.mxu1 %v559_v52 }
  0x48   :  { %646 = vmatpush.msra.mxu2 %v534_v41  ;;  %675 = vmatpush.msra.mxu3 %v566_v42 }
  0x49   :  { %592 = vmatpush.msra.mxu0 %v525_v59  ;;  %621 = vmatpush.msra.mxu1 %v557_v60 }
  0x4a   :  { %647 = vmatpush.msra.mxu2 %v532_v45  ;;  %676 = vmatpush.msra.mxu3 %v564_v46 }
  0x4b   :  { %593 = vmatpush.msra.mxu0 %v523_v63  ;;  %622 = vmatpush.msra.mxu1 %v555_v0 }
  0x4c   :  { %648 = vmatpush.msra.mxu2 %v530_v49  ;;  %677 = vmatpush.msra.mxu3 %v562_v50 }
  0x4d   :  { %594 = vmatpush.msra.mxu0 %v521_v3  ;;  %623 = vmatpush.msra.mxu1 %v553_v4 }
  0x4e   :  { %649 = vmatpush.msra.mxu2 %v528_v53  ;;  %678 = vmatpush.msra.mxu3 %v560_v56 }
  0x4f   :  { %595 = vmatpush.msra.mxu0 %v519_v7  ;;  %624 = vmatpush.msra.mxu1 %v551_v8 }
  0x50   :  { %650 = vmatpush.msra.mxu2 %v526_v61  ;;  %679 = vmatpush.msra.mxu3 %v558_v62 }
  0x51   :  { %596 = vmatpush.msra.mxu0 %v517_v15  ;;  %625 = vmatpush.msra.mxu1 %v549_v16 }
  0x52   :  { %651 = vmatpush.msra.mxu2 %v524_v1  ;;  %680 = vmatpush.msra.mxu3 %v556_v2 }
  0x54   :  { %652 = vmatpush.msra.mxu2 %v522_v5  ;;  %681 = vmatpush.msra.mxu3 %v554_v6 }
  0x56   :  { %653 = vmatpush.msra.mxu2 %v520_v9  ;;  %682 = vmatpush.msra.mxu3 %v552_v12 }
  0x58   :  { %654 = vmatpush.msra.mxu2 %v518_v19  ;;  %683 = vmatpush.msra.mxu3 %v550_v20 }
  0x87   :  { %v1275_v17 = vpop.f32.mrf.mxu0  ;;  %v1277_v18 = vpop.f32.mrf.mxu1 }
  0x8e   :  { %v1324_v34 = vpop.f32.mrf.mxu2  ;;  %v1326_v35 = vpop.f32.mrf.mxu3 }
  0x8f   :  { %v1331_v37 = vpop.f32.mrf.mxu0  ;;  %v1333_v38 = vpop.f32.mrf.mxu1 }
  0x96   :  { %v1380_v54 = vpop.f32.mrf.mxu2  ;;  %v1382_v55 = vpop.f32.mrf.mxu3 }
  0x97   :  { %v1387_v57 = vpop.f32.mrf.mxu0  ;;  %v1389_v58 = vpop.f32.mrf.mxu1 }
  0x98   :  { %v465_v33 = vmax.f32 %v1275_v17, %v1387_v57  ;;  %v466_v36 = vmax.f32 %v1277_v18, %v1389_v58 }
  0x9e   :  { %v252_v10 = vpop.f32.mrf.mxu2  ;;  %v275_v11 = vpop.f32.mrf.mxu3 }
  0x9f   :  { %v209_v13 = vpop.f32.mrf.mxu0  ;;  %v232_v14 = vpop.f32.mrf.mxu1  ;;  %v467_v61 = vmax.f32 %v1324_v34, %v252_v10  ;;  %v468_v62 = vmax.f32 %v1326_v35, %v275_v11 }
  0xa0   :  { %v494_v41 = vpop.permute.xlu0 %493  ;;  %v469_v50 = vmax.f32 %v1331_v37, %v209_v13  ;;  %v470_v17 = vmax.f32 %v1333_v38, %v232_v14 }
  0xa6   :  { %v255_v21 = vpop.f32.mrf.mxu2  ;;  %v278_v22 = vpop.f32.mrf.mxu3 }
  0xa7   :  { %v298_v23 = vpop.f32.mrf.mxu0  ;;  %v321_v24 = vpop.f32.mrf.mxu1  ;;  %v471_v34 = vmax.f32 %v1380_v54, %v255_v21  ;;  %v472_v35 = vmax.f32 %v1382_v55, %v278_v22 }
  0xa8   :  { %v499_v60 = vpop.permute.xlu0 %498 }
  0xae   :  { %v344_v25 = vpop.f32.mrf.mxu2  ;;  %v367_v26 = vpop.f32.mrf.mxu3 }
  0xaf   :  { %v301_v27 = vpop.f32.mrf.mxu0  ;;  %v324_v28 = vpop.f32.mrf.mxu1 }
  0xb6   :  { %v347_v29 = vpop.f32.mrf.mxu2  ;;  %v370_v30 = vpop.f32.mrf.mxu3 }
  0xb7   :  { %v390_v31 = vpop.f32.mrf.mxu0  ;;  %v413_v32 = vpop.f32.mrf.mxu1 }
  0xb8   :  { %v473_v39 = vmax.f32 %v298_v23, %v390_v31  ;;  %v474_v40 = vmax.f32 %v321_v24, %v413_v32  ;;  %v699_v24 = vld [vmem:[%s1491_s4 + $0x10] sm:$0xff] }
  0xba   :  { %v481_v42 = vmax.f32 %v465_v33, %v473_v39  ;;  %v482_v43 = vmax.f32 %v466_v36, %v474_v40  ;;  %v700_v39 = vld [vmem:[%s1491_s4 + $0x18] sm:$0xff] }
  0xbc   :  { %v501_v44 = vadd.f32 %v494_v41, %v481_v42  ;;  %v502_v45 = vadd.f32 %v494_v41, %v482_v43 }
  0xbe   :  { %v509_v46 = vmax.f32 %v501_v44, 0.0  ;;  %v510_v47 = vmax.f32 %v502_v45, 0.0  ;;  %v436_v48 = vpop.f32.mrf.mxu2  ;;  %v459_v49 = vpop.f32.mrf.mxu3 }
  0xbf   :  { %v393_v51 = vpop.f32.mrf.mxu0  ;;  %v416_v52 = vpop.f32.mrf.mxu1  ;;  %v475_v18 = vmax.f32 %v344_v25, %v436_v48  ;;  %v476_v57 = vmax.f32 %v367_v26, %v459_v49  ;;  %v697_v26 = vld [vmem:[%s1491_s4] sm:$0xff] }
  0xc0   :  { %v477_v53 = vmax.f32 %v301_v27, %v393_v51  ;;  %v478_v56 = vmax.f32 %v324_v28, %v416_v52  ;;  %597 = vmatmul.f32.vlgmr.msra.gmra.mxu0 %v509_v46  ;;  %626 = vmatmul.f32.vlgmr.msra.gmra.mxu1 %v510_v47 }
  0xc1   :  { %655 = vmatmul.f32.vlgmr.msra.gmra.mxu2 %v509_v46  ;;  %684 = vmatmul.f32.vlgmr.msra.gmra.mxu3 %v510_v47  ;;  %v483_v0 = vmax.f32 %v467_v61, %v475_v18  ;;  %v484_v1 = vmax.f32 %v468_v62, %v476_v57 }
  0xc2   :  { %v485_v58 = vmax.f32 %v469_v50, %v477_v53  ;;  %v486_v59 = vmax.f32 %v470_v17, %v478_v56 }
  0xc3   :  { %v503_v7 = vadd.f32 %v494_v41, %v483_v0  ;;  %v504_v8 = vadd.f32 %v494_v41, %v484_v1  ;;  %v698_v41 = vld [vmem:[%s1491_s4 + $0x8] sm:$0xff]  ;;  %s928_s4 = smov 16  }
  0xc4   :  { %v505_v37 = vadd.f32 %v499_v60, %v485_v58  ;;  %v506_v63 = vadd.f32 %v499_v60, %v486_v59 }
  0xc5   :  { %v511_v11 = vmax.f32 %v503_v7, 0.0  ;;  %v512_v12 = vmax.f32 %v504_v8, 0.0 }
  0xc6   :  { %v513_v38 = vmax.f32 %v505_v37, 0.0  ;;  %v514_v2 = vmax.f32 %v506_v63, 0.0  ;;  %v439_v3 = vpop.f32.mrf.mxu2  ;;  %v462_v4 = vpop.f32.mrf.mxu3 }
  0xc7   :  { %v479_v5 = vmax.f32 %v347_v29, %v439_v3  ;;  %v480_v6 = vmax.f32 %v370_v30, %v462_v4 }
  0xc8   :  { %600 = vmatmul.f32.gmra.mxu0 %v513_v38  ;;  %629 = vmatmul.f32.gmra.mxu1 %v514_v2 }
  0xc9   :  { %658 = vmatmul.f32.gmra.mxu2 %v513_v38  ;;  %687 = vmatmul.f32.gmra.mxu3 %v514_v2  ;;  %v487_v9 = vmax.f32 %v471_v34, %v479_v5  ;;  %v488_v10 = vmax.f32 %v472_v35, %v480_v6 }
  0xcb   :  { %v507_v13 = vadd.f32 %v499_v60, %v487_v9  ;;  %v508_v14 = vadd.f32 %v499_v60, %v488_v10 }
  0xcd   :  { %v515_v15 = vmax.f32 %v507_v13, 0.0  ;;  %v516_v16 = vmax.f32 %v508_v14, 0.0 }
  0xd0   :  { %603 = vmatmul.f32.gmra.mxu0 %v511_v11  ;;  %632 = vmatmul.f32.gmra.mxu1 %v512_v12 }
  0xd1   :  { %661 = vmatmul.f32.gmra.mxu2 %v511_v11  ;;  %690 = vmatmul.f32.gmra.mxu3 %v512_v12 }
  0xd8   :  { %606 = vmatmul.f32.gmra.mxu0 %v515_v15  ;;  %635 = vmatmul.f32.gmra.mxu1 %v516_v16 }
  0xd9   :  { %664 = vmatmul.f32.gmra.mxu2 %v515_v15  ;;  %693 = vmatmul.f32.gmra.mxu3 %v516_v16 }
 0x13d   :  { %v598_v19 = vpop.f32.mrf.mxu0  ;;  %v627_v54 = vpop.f32.mrf.mxu1 }
 0x13e   :  { %v628_v25 = vadd.f32 %v627_v54, %v598_v19 }
 0x140   :  { %v701_v28 = vmul.f32 %v697_v26, %v628_v25 }
 0x144   :  { %v656_v20 = vpop.f32.mrf.mxu2  ;;  %v685_v55 = vpop.f32.mrf.mxu3 }
 0x145   :  { %v601_v21 = vpop.f32.mrf.mxu0  ;;  %v630_v22 = vpop.f32.mrf.mxu1  ;;  %v686_v40 = vadd.f32 %v685_v55, %v656_v20  ;;  %v750_v20 = vlaneseq }
 0x146   :  { %v631_v23 = vadd.f32 %v630_v22, %v601_v21 }
 0x147   :  { %v702_v44 = vmul.f32 %v698_v41, %v686_v40  ;;  %v751_v21 = vand.u32 127, %v750_v20 }
 0x148   :  { %v703_v27 = vmul.f32 %v699_v24, %v631_v23 }
 0x149   :  { %vm752_vm2 = vcmp.lt.s32.totalorder %v751_v21, 16  ;;  %vm781_vm3 = vcmp.lt.s32.totalorder %v751_v21, 32  ;;  %vm810_vm4 = vcmp.lt.s32.totalorder %v751_v21, 64 }
 0x14a   :  { %v709_v33 = vadd.f32 %v703_v27, %v701_v28 }
 0x14c   :  { %v659_v29 = vpop.f32.mrf.mxu2  ;;  %v688_v30 = vpop.f32.mrf.mxu3  ;;  %v710_v42 = vrot.slane %v709_v33, 4 }
 0x14d   :  { %v604_v31 = vpop.f32.mrf.mxu0  ;;  %v633_v32 = vpop.f32.mrf.mxu1  ;;  %v689_v36 = vadd.f32 %v688_v30, %v659_v29 }
 0x14e   :  { %v634_v45 = vadd.f32 %v633_v32, %v604_v31  ;;  %v711_v50 = vadd.f32 %v710_v42, %v709_v33 }
 0x14f   :  { %v704_v43 = vmul.f32 %v700_v39, %v689_v36 }
 0x150   :  { %v705_v17 = vmul.f32 %v697_v26, %v634_v45  ;;  %v712_v56 = vrot.slane %v711_v50, 2 }
 0x151   :  { %v716_v51 = vadd.f32 %v704_v43, %v702_v44 }
 0x152   :  { %v713_v0 = vadd.f32 %v712_v56, %v711_v50 }
 0x153   :  { %v717_v18 = vrot.slane %v716_v51, 4 }
 0x154   :  { %v662_v46 = vpop.f32.mrf.mxu2  ;;  %v691_v47 = vpop.f32.mrf.mxu3  ;;  %v714_v5 = vrot.slane %v713_v0, 1 }
 0x155   :  { %v607_v48 = vpop.f32.mrf.mxu0  ;;  %v636_v49 = vpop.f32.mrf.mxu1  ;;  %v692_v58 = vadd.f32 %v691_v47, %v662_v46  ;;  %v718_v37 = vadd.f32 %v717_v18, %v716_v51 }
 0x156   :  { %v637_v52 = vadd.f32 %v636_v49, %v607_v48  ;;  %v715_v35 = vadd.f32 %v714_v5, %v713_v0 }
 0x157   :  { %v706_v1 = vmul.f32 %v698_v41, %v692_v58  ;;  %v719_v4 = vrot.slane %v718_v37, 2 }
 0x158   :  { %v707_v53 = vmul.f32 %v699_v24, %v637_v52 }
 0x159   :  { %v720_v10 = vadd.f32 %v719_v4, %v718_v37 }
 0x15a   :  { %v723_v57 = vadd.f32 %v707_v53, %v705_v17 }
 0x15b   :  { %v721_v14 = vrot.slane %v720_v10, 1 }
 0x15c   :  { %v724_v59 = vrot.slane %v723_v57, 4  ;;  %v665_v60 = vpop.f32.mrf.mxu2  ;;  %v694_v61 = vpop.f32.mrf.mxu3 }
 0x15d   :  { %v695_v62 = vadd.f32 %v694_v61, %v665_v60  ;;  %v722_v19 = vadd.f32 %v721_v14, %v720_v10 }
 0x15e   :  { %v725_v63 = vadd.f32 %v724_v59, %v723_v57 }
 0x15f   :  { %v708_v38 = vmul.f32 %v700_v39, %v695_v62 }
 0x160   :  { %v726_v2 = vrot.slane %v725_v63, 2 }
 0x161   :  { %v730_v3 = vadd.f32 %v708_v38, %v706_v1  ;;  %v900_v1 = vld [vmem:[%s1492_s5] ss:$0 sm:$0xff] }
 0x162   :  { %v727_v6 = vadd.f32 %v726_v2, %v725_v63 }
 0x163   :  { %v731_v7 = vrot.slane %v730_v3, 4 }
 0x164   :  { %v728_v8 = vrot.slane %v727_v6, 1 }
 0x165   :  { %v732_v34 = vadd.f32 %v731_v7, %v730_v3 }
 0x166   :  { %v729_v9 = vadd.f32 %v728_v8, %v727_v6 }
 0x167   :  { %v733_v11 = vrot.slane %v732_v34, 2 }
 0x168   :  { %v742_v12 = vsel %vm741_vm1, %v729_v9, %v715_v35 }
 0x169   :  { %746 = vrot.lane.b32.xlu1 %v742_v12, %s928_s4  ;;  %v734_v13 = vadd.f32 %v733_v11, %v732_v34 }
 0x16b   :  { %v735_v15 = vrot.slane %v734_v13, 1 }
 0x16d   :  { %v736_v16 = vadd.f32 %v735_v15, %v734_v13 }
 0x16f   :  { %v743_v54 = vsel %vm741_vm1, %v736_v16, %v722_v19 }
 0x171   :  { %748 = vrot.lane.b32.xlu1 %v743_v54, %s928_s4 }
 0x1db   :  { %v747_v55 = vpop.permute.xlu1 %746 }
 0x1e3   :  { %v749_v22 = vpop.permute.xlu1 %748 }
 0x1e4   :  { %v753_v23 = vsel %vm752_vm2, %v747_v55, %v749_v22  ;;  %v754_v24 = vsel %vm752_vm2, %v749_v22, %v747_v55 }
 0x1e5   :  { %v757_v25 = vrot.slane %v754_v24, 1  ;;  %v758_v26 = vrot.slane %v753_v23, 1  ;;  %v763_v28 = vadd.f32 %v754_v24, %v715_v35  ;;  %v764_v33 = vadd.f32 %v753_v23, %v722_v19 }
 0x1e7   :  { %v765_v27 = vadd.f32 %v757_v25, %v729_v9  ;;  %v766_v30 = vadd.f32 %v758_v26, %v736_v16 }
 0x1e9   :  { %v771_v29 = vrot.slane %v765_v27, 7  ;;  %v773_v32 = vrot.slane %v766_v30, 7 }
 0x1eb   :  { %v772_v31 = vsel %vm741_vm1, %v771_v29, %v763_v28  ;;  %v774_v36 = vsel %vm741_vm1, %v773_v32, %v764_v33 }
 0x1ec   :  { %777 = vrot.lane.b32.xlu2 %v772_v31, %s929_s2 }
 0x1f4   :  { %779 = vrot.lane.b32.xlu2 %v774_v36, %s929_s2 }
 0x246   :  { %v778_v39 = vpop.permute.xlu2 %777 }
 0x24e   :  { %v780_v40 = vpop.permute.xlu2 %779 }
 0x24f   :  { %v782_v41 = vsel %vm781_vm3, %v778_v39, %v780_v40  ;;  %v783_v42 = vsel %vm781_vm3, %v780_v40, %v778_v39 }
 0x250   :  { %v786_v43 = vrot.slane %v783_v42, 1  ;;  %v787_v44 = vrot.slane %v782_v41, 1  ;;  %v792_v47 = vadd.f32 %v783_v42, %v763_v28  ;;  %v793_v48 = vadd.f32 %v782_v41, %v764_v33 }
 0x252   :  { %v794_v45 = vadd.f32 %v786_v43, %v765_v27  ;;  %v795_v46 = vadd.f32 %v787_v44, %v766_v30 }
 0x254   :  { %v800_v49 = vrot.slane %v794_v45, 7  ;;  %v802_v50 = vrot.slane %v795_v46, 7 }
 0x256   :  { %v801_v51 = vsel %vm741_vm1, %v800_v49, %v792_v47  ;;  %v803_v52 = vsel %vm741_vm1, %v802_v50, %v793_v48 }
 0x257   :  { %806 = vrot.lane.b32.xlu0 %v801_v51, %s930_s9  ;;  %808 = vrot.lane.b32.xlu1 %v803_v52, %s930_s9 }
 0x2c9   :  { %v807_v17 = vpop.permute.xlu0 %806  ;;  %v809_v53 = vpop.permute.xlu1 %808 }
 0x2ca   :  { %v811_v56 = vsel %vm810_vm4, %v807_v17, %v809_v53  ;;  %v812_v18 = vsel %vm810_vm4, %v809_v53, %v807_v17 }
 0x2cb   :  { %v816_v57 = vrot.slane %v811_v56, 1  ;;  %v815_v59 = vrot.slane %v812_v18, 1  ;;  %v822_v60 = vadd.f32 %v811_v56, %v793_v48  ;;  %v821_v37 = vadd.f32 %v812_v18, %v792_v47 }
 0x2cd   :  { %v824_v58 = vadd.f32 %v816_v57, %v795_v46  ;;  %v823_v63 = vadd.f32 %v815_v59, %v794_v45 }
 0x2cf   :  { %v827_v61 = vrot.slane %v824_v58, 7 }
 0x2d1   :  { %v828_v62 = vsel %vm741_vm1, %v827_v61, %v822_v60 }
 0x2d2   :  { %v829_v0 = vrot.slane %v828_v62, 1  ;;  %v832_v38 = vadd.f32 %v828_v62, %v821_v37 }
 0x2d4   :  { %v833_v2 = vadd.f32 %v829_v0, %v823_v63  ;;  %v838_v4 = vadd.f32 %v900_v1, %v832_v38 }
 0x2d6   :  { %v839_v3 = vadd.f32 %v900_v1, %v833_v2 }
 0x2d8   :  { %v842_v5 = vrot.slane %v839_v3, 7 }
 0x2da   :  { %v843_v6 = vsel %vm741_vm1, %v842_v5, %v838_v4 }
 0x2db   :  { %845 = vst [vmem:[#allocation2] sm:$0x3] %v843_v6 }
 0x2dc   :  { %856 = dma.vmem_to_hbm [thread:$0]  %s852_s1, 32, %s854_s15, [#allocation3]  }
 0x2dd   :  { %925 = dma.done.wait [#allocation3], 32  }
 0x2de   :  { %926 = vsyncadd [#allocation3], 4294967264 }
 0x2df   :  { %861 = vsyncpa [#allocation3], 1 }

</bundles_post_ra>
